<compile_context>
chip_gen: v5e
topology: v5e:2x2
jax: 0.10.0
libtpu: 0.0.40
codegen_flags: <defaults>
</compile_context>

<pallas_src>
import functools
import math

import jax
import jax.numpy as jnp
import numpy as np
from jax.experimental import pallas as pl
from jax.experimental.pallas import tpu as pltpu

_LANES = 128


def _pow_specialized(x, gamma):
    """focal ** gamma, with small integer gammas lowered to VPU multiplies."""
    g = float(gamma)
    if g == int(g) and 0 <= int(g) <= 8:
        gi = int(g)
        if gi == 0:
            return jnp.ones_like(x)
        r = x
        for _ in range(gi - 1):
            r = r * x
        return r
    return jnp.power(x, g)


def _focal_loss_kernel(x_ref, t_ref, w_ref, loss_out_ref, wsum_out_ref, *,
                       gamma, eps, ignore_index, num_classes, rows_total,
                       block_rows, need_row_mask, unroll_classes):
    g_idx = pl.program_id(1)
    C = num_classes
    R = block_rows

    t = t_ref[0]                                       # (R, 128) int32 labels

    m0 = jnp.full((R, _LANES), -jnp.inf, jnp.float32)
    xt0 = jnp.zeros((R, _LANES), jnp.float32)
    wr0 = jnp.zeros((R, _LANES), jnp.float32)

    # ---- pass 1: running class max + target-logit / class-weight gather ----
    def pass1(c, carry):
        m, x_t, wrow = carry
        xc = x_ref[0, c].astype(jnp.float32)           # (R, 128), cast in-kernel
        sel = t == c
        m = jnp.maximum(m, xc)
        x_t = jnp.where(sel, xc, x_t)
        wrow = jnp.where(sel, w_ref[c], wrow)          # scalar w[c] from SMEM
        return m, x_t, wrow

    if unroll_classes:
        carry = (m0, xt0, wr0)
        for c in range(C):
            carry = pass1(c, carry)
        m, x_t, wrow = carry
    else:
        m, x_t, wrow = jax.lax.fori_loop(0, C, pass1, (m0, xt0, wr0))

    # ---- pass 2: sum_c exp(x_c - m) -----------------------------------------
    def pass2(c, s):
        xc = x_ref[0, c].astype(jnp.float32)
        return s + jnp.exp(xc - m)

    s0 = jnp.zeros((R, _LANES), jnp.float32)
    if unroll_classes:
        sumexp = s0
        for c in range(C):
            sumexp = pass2(c, sumexp)
    else:
        sumexp = jax.lax.fori_loop(0, C, pass2, s0)

    # ---- validity: ignore_index labels (+ static tail-row mask if needed) ---
    valid = t != ignore_index                          # (R, 128)
    if need_row_mask:
        row = jax.lax.broadcasted_iota(jnp.int32, (R, _LANES), 0)
        valid = jnp.logical_and(valid, row < (rows_total - g_idx * R))

    # ---- focal loss pieces (no full softmax matrix) --------------------------
    inv_sumexp = pl.reciprocal(sumexp, approx=True)    # EUP vrcp
    pt = jnp.exp(x_t - m) * inv_sumexp
    # log-sum-exp form of -log(softmax_t); clamp to -log(eps) to emulate the
    # reference's `-log(eps + pt)` flooring for vanishing pt.
    nll = jnp.log(sumexp) - (x_t - m)
    if eps > 0.0:
        nll = jnp.minimum(nll, jnp.float32(-math.log(eps)))

    focal = 1.0 - pt
    loss = jnp.where(valid, wrow * _pow_specialized(focal, gamma) * nll, 0.0)
    wcol = jnp.where(valid, wrow, 0.0)

    # Per-step partial sums (XLU reduce); tiny per-(n, g) output writes.
    loss_out_ref[...] = jnp.sum(loss).reshape(1, 1, 1, 1)
    wsum_out_ref[...] = jnp.sum(wcol).reshape(1, 1, 1, 1)


def focal_loss(x, target, weight=None, *, gamma=2.0, ignore_index=-100,
               eps=1e-16, reduction="mean", block_rows=None):
    """x: (N, C, H, W) float logits; target: (N, H, W) int labels;
    weight: (C,) per-class weights or None.  Returns scalar ('mean'/'sum')."""
    assert reduction in ("mean", "sum"), "only 'mean'/'sum' implemented in-kernel"
    # TODO(synk): reduction='none' (per-element loss output) not wired up.
    N, C, H, W = x.shape
    HW = H * W
    itemsize = jnp.dtype(x.dtype).itemsize

    # Pad the flattened spatial axis to a multiple of 128 lanes.  Padded label
    # positions get ignore_index so they are masked in-kernel; this copy only
    # happens when HW is not already lane-aligned.
    hw_pad = ((HW + _LANES - 1) // _LANES) * _LANES
    x3 = x.reshape(N, C, HW)
    t2 = target.reshape(N, HW).astype(jnp.int32)
    if hw_pad != HW:
        x3 = jnp.pad(x3, ((0, 0), (0, 0), (0, hw_pad - HW)))
        t2 = jnp.pad(t2, ((0, 0), (0, hw_pad - HW)),
                     constant_values=np.int32(ignore_index))
    rows = hw_pad // _LANES
    x4 = x3.reshape(N, C, rows, _LANES)                # free view (contiguous)
    t3 = t2.reshape(N, rows, _LANES)

    if weight is None:
        weight = jnp.ones((C,), jnp.float32)
    w1 = weight.astype(jnp.float32).reshape(C)

    # ---- generation-aware tile sizing & VMEM budget --------------------------
    try:
        vmem_cap = int(pltpu.get_tpu_info().vmem_capacity_bytes)
    except Exception:
        vmem_cap = 64 << 20                            # conservative (v7x-sized)
    # Per-buffer logits budget: wide tiles where VMEM is large (v5e/v6e 128 MiB),
    # tighter on v7x (64 MiB physical / 32 MiB scoped).
    buf_budget = (6 << 20) if vmem_cap >= (100 << 20) else (3 << 20)

    if block_rows is None:
        r = buf_budget // (C * _LANES * itemsize)
        r = int(max(8, min(r, 1024)))
        r = (r // 8) * 8
        block_rows = rows if r >= rows else r          # full extent or mult-of-8
    R = int(block_rows)
    G = pl.cdiv(rows, R)
    need_row_mask = (rows % R) != 0                    # only partial last block

    x_block_bytes = C * R * _LANES * itemsize
    t_block_bytes = R * _LANES * 4
    if 2 * x_block_bytes > int(0.7 * vmem_cap):
        # TODO(synk): class-axis tiling (online softmax over a 3rd grid dim)
        # for vocabulary-scale C; not needed for segmentation-sized classes.
        raise NotImplementedError("class dimension too large for one VMEM block")

    est = 2 * (x_block_bytes + t_block_bytes) + 20 * R * _LANES * 4 + (2 << 20)
    vmem_limit = int(min(int(vmem_cap * 0.9), max(est, 32 << 20)))

    kernel = functools.partial(
        _focal_loss_kernel, gamma=float(gamma), eps=float(eps),
        ignore_index=int(ignore_index), num_classes=C, rows_total=rows,
        block_rows=R, need_row_mask=need_row_mask, unroll_classes=(C <= 32))

    loss_p, w_p = pl.pallas_call(
        kernel,
        out_shape=(jax.ShapeDtypeStruct((N, G, 1, 1), jnp.float32),
                   jax.ShapeDtypeStruct((N, G, 1, 1), jnp.float32)),
        grid_spec=pltpu.PrefetchScalarGridSpec(
            num_scalar_prefetch=0,
            grid=(N, G),
            in_specs=[
                pl.BlockSpec((1, C, R, _LANES), lambda n, g: (n, 0, g, 0)),
                pl.BlockSpec((1, R, _LANES), lambda n, g: (n, g, 0)),
                pl.BlockSpec(memory_space=pltpu.MemorySpace.SMEM),
            ],
            out_specs=[
                pl.BlockSpec((1, 1, 1, 1), lambda n, g: (n, g, 0, 0)),
                pl.BlockSpec((1, 1, 1, 1), lambda n, g: (n, g, 0, 0)),
            ],
        ),
        compiler_params=pltpu.CompilerParams(
            dimension_semantics=("parallel", "parallel"),
            vmem_limit_bytes=vmem_limit),
    )(x4, t3, w1)

    loss_sum = jnp.sum(loss_p)
    if reduction == "sum":
        return loss_sum
    return loss_sum / jnp.sum(w_p)


def _focal_loss_ref(x, target, weight, gamma, ignore_index, eps):
    """Pure-JAX reference reproducing the PyTorch module semantics."""
    N, C, H, W = x.shape
    M = N * H * W
    mask = (target == ignore_index).reshape(M)
    p = jax.nn.softmax(x.astype(jnp.float32), axis=1)
    p = jnp.transpose(p.reshape(N, C, H * W), (0, 2, 1)).reshape(M, C)
    t = target.reshape(M)
    t = jnp.where(mask, 0, t)
    onehot = jax.nn.one_hot(t, C, dtype=jnp.float32)
    weights = (onehot * weight.astype(jnp.float32)).sum(-1)
    pt = (onehot * p).sum(-1) * (~mask)
    focal = 1.0 - pt
    nll = -jnp.log(eps + pt)
    nll = jnp.where(mask, 0.0, nll)
    loss = weights * focal ** gamma * nll
    return loss.sum() / ((~mask) * weights).sum()


if __name__ == "__main__":
    key = jax.random.PRNGKey(0)
    k_x, k_t, k_m = jax.random.split(key, 3)

    N, C, H, W = 2, 4, 16, 16
    gamma = 2.0
    ignore_index = -100
    eps = 1e-16

    x = jax.random.normal(k_x, (N, C, H, W), dtype=jnp.float32)
    target = jax.random.randint(k_t, (N, H, W), 0, C, dtype=jnp.int32)
    # Sprinkle some ignored positions.
    ignore_mask = jax.random.uniform(k_m, (N, H, W)) < 0.1
    target = jnp.where(ignore_mask, jnp.int32(ignore_index), target)

    # Deterministic per-class weights (size C), as allowed by __init__.
    weight = jnp.linspace(0.5, 1.5, C, dtype=jnp.float32)

    out = focal_loss(x, target, weight, gamma=gamma,
                     ignore_index=ignore_index, eps=eps, reduction="mean")
    out = jax.block_until_ready(out)

    ref = _focal_loss_ref(x, target, weight, gamma, ignore_index, eps)
    np.testing.assert_allclose(np.asarray(out), np.asarray(ref),
                               rtol=2e-3, atol=1e-6)
    print("KERNEL_OK")
</pallas_src>

<mosaic_0001>
module attributes {stable_mosaic.version = 11 : i64} {
  func.func @_focal_loss_kernel(%arg0: i32, %arg1: i32, %arg2: memref<1x4x2x128xf32, #tpu.memory_space<vmem>>, %arg3: memref<1x2x128xi32, #tpu.memory_space<vmem>>, %arg4: memref<4xf32, #tpu.memory_space<smem>>, %arg5: memref<1x1x1x1xf32, #tpu.memory_space<vmem>>, %arg6: memref<1x1x1x1xf32, #tpu.memory_space<vmem>>) attributes {dimension_semantics = [#tpu.dimension_semantics<parallel>, #tpu.dimension_semantics<parallel>], iteration_bounds = array<i64: 2, 1>, scalar_prefetch = 0 : i64, scratch_operands = 0 : i64, tpu.core_type = #tpu.core_type<tc>, window_params = [{transform_indices = @transform_0, window_bounds = array<i64: 1, 4, 2, 128>}, {transform_indices = @transform_1, window_bounds = array<i64: 1, 2, 128>}, {transform_indices = @transform_2, window_bounds = array<i64: 4>}, {transform_indices = @transform_3, window_bounds = array<i64: 1, 1, 1, 1>}, {transform_indices = @transform_4, window_bounds = array<i64: 1, 1, 1, 1>}]} {
    %c0 = arith.constant 0 : index
    %c0_0 = arith.constant 0 : index
    %c0_1 = arith.constant 0 : index
    %0 = vector.load %arg3[%c0, %c0_0, %c0_1] : memref<1x2x128xi32, #tpu.memory_space<vmem>>, vector<1x2x128xi32>
    %1 = vector.shape_cast %0 : vector<1x2x128xi32> to vector<2x128xi32>
    %cst = arith.constant 0xFF800000 : f32
    %2 = vector.broadcast %cst : f32 to vector<2x128xf32>
    %cst_2 = arith.constant 0.000000e+00 : f32
    %3 = vector.broadcast %cst_2 : f32 to vector<2x128xf32>
    %cst_3 = arith.constant 0.000000e+00 : f32
    %4 = vector.broadcast %cst_3 : f32 to vector<2x128xf32>
    %c0_4 = arith.constant 0 : index
    %c0_5 = arith.constant 0 : index
    %c0_6 = arith.constant 0 : index
    %c0_7 = arith.constant 0 : index
    %5 = vector.load %arg2[%c0_4, %c0_5, %c0_6, %c0_7] : memref<1x4x2x128xf32, #tpu.memory_space<vmem>>, vector<1x1x2x128xf32>
    %6 = vector.shape_cast %5 : vector<1x1x2x128xf32> to vector<2x128xf32>
    %c0_i32 = arith.constant 0 : i32
    %7 = vector.broadcast %c0_i32 : i32 to vector<2x128xi32>
    %8 = arith.cmpi eq, %1, %7 : vector<2x128xi32>
    %9 = arith.maximumf %2, %6 : vector<2x128xf32>
    %10 = arith.select %8, %6, %3 : vector<2x128xi1>, vector<2x128xf32>
    %c0_8 = arith.constant 0 : index
    %11 = memref.load %arg4[%c0_8] : memref<4xf32, #tpu.memory_space<smem>>
    %12 = vector.broadcast %11 : f32 to vector<2x128xf32>
    %13 = arith.select %8, %12, %4 : vector<2x128xi1>, vector<2x128xf32>
    %c0_9 = arith.constant 0 : index
    %c1 = arith.constant 1 : index
    %c0_10 = arith.constant 0 : index
    %c0_11 = arith.constant 0 : index
    %14 = vector.load %arg2[%c0_9, %c1, %c0_10, %c0_11] : memref<1x4x2x128xf32, #tpu.memory_space<vmem>>, vector<1x1x2x128xf32>
    %15 = vector.shape_cast %14 : vector<1x1x2x128xf32> to vector<2x128xf32>
    %c1_i32 = arith.constant 1 : i32
    %16 = vector.broadcast %c1_i32 : i32 to vector<2x128xi32>
    %17 = arith.cmpi eq, %1, %16 : vector<2x128xi32>
    %18 = arith.maximumf %9, %15 : vector<2x128xf32>
    %19 = arith.select %17, %15, %10 : vector<2x128xi1>, vector<2x128xf32>
    %c1_12 = arith.constant 1 : index
    %20 = memref.load %arg4[%c1_12] : memref<4xf32, #tpu.memory_space<smem>>
    %21 = vector.broadcast %20 : f32 to vector<2x128xf32>
    %22 = arith.select %17, %21, %13 : vector<2x128xi1>, vector<2x128xf32>
    %c0_13 = arith.constant 0 : index
    %c2 = arith.constant 2 : index
    %c0_14 = arith.constant 0 : index
    %c0_15 = arith.constant 0 : index
    %23 = vector.load %arg2[%c0_13, %c2, %c0_14, %c0_15] : memref<1x4x2x128xf32, #tpu.memory_space<vmem>>, vector<1x1x2x128xf32>
    %24 = vector.shape_cast %23 : vector<1x1x2x128xf32> to vector<2x128xf32>
    %c2_i32 = arith.constant 2 : i32
    %25 = vector.broadcast %c2_i32 : i32 to vector<2x128xi32>
    %26 = arith.cmpi eq, %1, %25 : vector<2x128xi32>
    %27 = arith.maximumf %18, %24 : vector<2x128xf32>
    %28 = arith.select %26, %24, %19 : vector<2x128xi1>, vector<2x128xf32>
    %c2_16 = arith.constant 2 : index
    %29 = memref.load %arg4[%c2_16] : memref<4xf32, #tpu.memory_space<smem>>
    %30 = vector.broadcast %29 : f32 to vector<2x128xf32>
    %31 = arith.select %26, %30, %22 : vector<2x128xi1>, vector<2x128xf32>
    %c0_17 = arith.constant 0 : index
    %c3 = arith.constant 3 : index
    %c0_18 = arith.constant 0 : index
    %c0_19 = arith.constant 0 : index
    %32 = vector.load %arg2[%c0_17, %c3, %c0_18, %c0_19] : memref<1x4x2x128xf32, #tpu.memory_space<vmem>>, vector<1x1x2x128xf32>
    %33 = vector.shape_cast %32 : vector<1x1x2x128xf32> to vector<2x128xf32>
    %c3_i32 = arith.constant 3 : i32
    %34 = vector.broadcast %c3_i32 : i32 to vector<2x128xi32>
    %35 = arith.cmpi eq, %1, %34 : vector<2x128xi32>
    %36 = arith.maximumf %27, %33 : vector<2x128xf32>
    %37 = arith.select %35, %33, %28 : vector<2x128xi1>, vector<2x128xf32>
    %c3_20 = arith.constant 3 : index
    %38 = memref.load %arg4[%c3_20] : memref<4xf32, #tpu.memory_space<smem>>
    %39 = vector.broadcast %38 : f32 to vector<2x128xf32>
    %40 = arith.select %35, %39, %31 : vector<2x128xi1>, vector<2x128xf32>
    %cst_21 = arith.constant 0.000000e+00 : f32
    %41 = vector.broadcast %cst_21 : f32 to vector<2x128xf32>
    %c0_22 = arith.constant 0 : index
    %c0_23 = arith.constant 0 : index
    %c0_24 = arith.constant 0 : index
    %c0_25 = arith.constant 0 : index
    %42 = vector.load %arg2[%c0_22, %c0_23, %c0_24, %c0_25] : memref<1x4x2x128xf32, #tpu.memory_space<vmem>>, vector<1x1x2x128xf32>
    %43 = vector.shape_cast %42 : vector<1x1x2x128xf32> to vector<2x128xf32>
    %44 = arith.subf %43, %36 : vector<2x128xf32>
    %45 = math.exp %44 : vector<2x128xf32>
    %46 = arith.addf %41, %45 : vector<2x128xf32>
    %c0_26 = arith.constant 0 : index
    %c1_27 = arith.constant 1 : index
    %c0_28 = arith.constant 0 : index
    %c0_29 = arith.constant 0 : index
    %47 = vector.load %arg2[%c0_26, %c1_27, %c0_28, %c0_29] : memref<1x4x2x128xf32, #tpu.memory_space<vmem>>, vector<1x1x2x128xf32>
    %48 = vector.shape_cast %47 : vector<1x1x2x128xf32> to vector<2x128xf32>
    %49 = arith.subf %48, %36 : vector<2x128xf32>
    %50 = math.exp %49 : vector<2x128xf32>
    %51 = arith.addf %46, %50 : vector<2x128xf32>
    %c0_30 = arith.constant 0 : index
    %c2_31 = arith.constant 2 : index
    %c0_32 = arith.constant 0 : index
    %c0_33 = arith.constant 0 : index
    %52 = vector.load %arg2[%c0_30, %c2_31, %c0_32, %c0_33] : memref<1x4x2x128xf32, #tpu.memory_space<vmem>>, vector<1x1x2x128xf32>
    %53 = vector.shape_cast %52 : vector<1x1x2x128xf32> to vector<2x128xf32>
    %54 = arith.subf %53, %36 : vector<2x128xf32>
    %55 = math.exp %54 : vector<2x128xf32>
    %56 = arith.addf %51, %55 : vector<2x128xf32>
    %c0_34 = arith.constant 0 : index
    %c3_35 = arith.constant 3 : index
    %c0_36 = arith.constant 0 : index
    %c0_37 = arith.constant 0 : index
    %57 = vector.load %arg2[%c0_34, %c3_35, %c0_36, %c0_37] : memref<1x4x2x128xf32, #tpu.memory_space<vmem>>, vector<1x1x2x128xf32>
    %58 = vector.shape_cast %57 : vector<1x1x2x128xf32> to vector<2x128xf32>
    %59 = arith.subf %58, %36 : vector<2x128xf32>
    %60 = math.exp %59 : vector<2x128xf32>
    %61 = arith.addf %56, %60 : vector<2x128xf32>
    %c-100_i32 = arith.constant -100 : i32
    %62 = vector.broadcast %c-100_i32 : i32 to vector<2x128xi32>
    %63 = arith.cmpi ne, %1, %62 : vector<2x128xi32>
    %64 = tpu.reciprocal %61 {approx = true} : vector<2x128xf32> -> vector<2x128xf32>
    %65 = arith.subf %37, %36 : vector<2x128xf32>
    %66 = math.exp %65 : vector<2x128xf32>
    %67 = arith.mulf %66, %64 : vector<2x128xf32>
    %68 = math.log %61 : vector<2x128xf32>
    %69 = arith.subf %37, %36 : vector<2x128xf32>
    %70 = arith.subf %68, %69 : vector<2x128xf32>
    %cst_38 = arith.constant 36.841362 : f32
    %71 = vector.broadcast %cst_38 : f32 to vector<2x128xf32>
    %72 = arith.minimumf %70, %71 : vector<2x128xf32>
    %cst_39 = arith.constant 1.000000e+00 : f32
    %73 = vector.broadcast %cst_39 : f32 to vector<2x128xf32>
    %74 = arith.subf %73, %67 : vector<2x128xf32>
    %75 = arith.mulf %74, %74 : vector<2x128xf32>
    %76 = arith.mulf %40, %75 : vector<2x128xf32>
    %77 = arith.mulf %76, %72 : vector<2x128xf32>
    %cst_40 = arith.constant 0.000000e+00 : f32
    %78 = vector.broadcast %cst_40 : f32 to vector<2x128xf32>
    %79 = arith.select %63, %77, %78 : vector<2x128xi1>, vector<2x128xf32>
    %cst_41 = arith.constant 0.000000e+00 : f32
    %80 = vector.broadcast %cst_41 : f32 to vector<2x128xf32>
    %81 = arith.select %63, %40, %80 : vector<2x128xi1>, vector<2x128xf32>
    %82 = vector.shape_cast %79 : vector<2x128xf32> to vector<1x2x128xf32>
    %cst_42 = arith.constant dense<0.000000e+00> : vector<1xf32>
    %83 = vector.multi_reduction <add>, %82, %cst_42 [1, 2] : vector<1x2x128xf32> to vector<1xf32>
    %84 = vector.shape_cast %83 : vector<1xf32> to vector<1x1x1xf32>
    %85 = vector.extract %84[0, 0, 0] : f32 from vector<1x1x1xf32>
    %86 = vector.broadcast %85 : f32 to vector<1x1x1x1xf32>
    %c0_43 = arith.constant 0 : index
    %c0_44 = arith.constant 0 : index
    %c0_45 = arith.constant 0 : index
    %c0_46 = arith.constant 0 : index
    %87 = vector.load %arg5[%c0_43, %c0_44, %c0_45, %c0_46] : memref<1x1x1x1xf32, #tpu.memory_space<vmem>>, vector<1x1x1x1xf32>
    tpu.vector_store %arg5[%c0_43, %c0_44, %c0_45, %c0_46], %86 {strides = array<i32>} : memref<1x1x1x1xf32, #tpu.memory_space<vmem>>, vector<1x1x1x1xf32>,
    %88 = vector.shape_cast %81 : vector<2x128xf32> to vector<1x2x128xf32>
    %cst_47 = arith.constant dense<0.000000e+00> : vector<1xf32>
    %89 = vector.multi_reduction <add>, %88, %cst_47 [1, 2] : vector<1x2x128xf32> to vector<1xf32>
    %90 = vector.shape_cast %89 : vector<1xf32> to vector<1x1x1xf32>
    %91 = vector.extract %90[0, 0, 0] : f32 from vector<1x1x1xf32>
    %92 = vector.broadcast %91 : f32 to vector<1x1x1x1xf32>
    %c0_48 = arith.constant 0 : index
    %c0_49 = arith.constant 0 : index
    %c0_50 = arith.constant 0 : index
    %c0_51 = arith.constant 0 : index
    %93 = vector.load %arg6[%c0_48, %c0_49, %c0_50, %c0_51] : memref<1x1x1x1xf32, #tpu.memory_space<vmem>>, vector<1x1x1x1xf32>
    tpu.vector_store %arg6[%c0_48, %c0_49, %c0_50, %c0_51], %92 {strides = array<i32>} : memref<1x1x1x1xf32, #tpu.memory_space<vmem>>, vector<1x1x1x1xf32>,
    return
  }
  func.func @transform_0(%arg0: i32, %arg1: i32) -> (i32, i32, i32, i32) {
    %c0_i32 = arith.constant 0 : i32
    %c0_i32_0 = arith.constant 0 : i32
    %c0_i32_1 = arith.constant 0 : i32
    return %arg0, %c0_i32, %arg1, %c0_i32_0 : i32, i32, i32, i32
  }
  func.func @transform_1(%arg0: i32, %arg1: i32) -> (i32, i32, i32) {
    %c0_i32 = arith.constant 0 : i32
    %c0_i32_0 = arith.constant 0 : i32
    return %arg0, %arg1, %c0_i32 : i32, i32, i32
  }
  func.func @transform_2(%arg0: i32, %arg1: i32) -> i32 {
    %c0_i32 = arith.constant 0 : i32
    %c0_i32_0 = arith.constant 0 : i32
    return %c0_i32 : i32
  }
  func.func @transform_3(%arg0: i32, %arg1: i32) -> (i32, i32, i32, i32) {
    %c0_i32 = arith.constant 0 : i32
    %c0_i32_0 = arith.constant 0 : i32
    %c0_i32_1 = arith.constant 0 : i32
    return %arg0, %arg1, %c0_i32, %c0_i32_0 : i32, i32, i32, i32
  }
  func.func @transform_4(%arg0: i32, %arg1: i32) -> (i32, i32, i32, i32) {
    %c0_i32 = arith.constant 0 : i32
    %c0_i32_0 = arith.constant 0 : i32
    %c0_i32_1 = arith.constant 0 : i32
    return %arg0, %arg1, %c0_i32, %c0_i32_0 : i32, i32, i32, i32
  }
}

</mosaic_0001>

<bundles_post_ra>
// kernel: tpu_custom_call.1
= control target key start
LH: loop header
LB: loop body
LE: loop exit
PB: predicated region body
PF: predicated region fallthrough
CT: control target
= control target key end

     0   :  { %s983_s0 = inlined_call_operand.hbm [shape: f32[2,4,2,128], index: 0, kind: input, shape index: {}]   ;;  %s984_s1 = inlined_call_operand.hbm [shape: s32[2,2,128], index: 1, kind: input, shape index: {}]   ;;  %s985_s2 = inlined_call_operand.vmem [shape: f32[4], index: 2, kind: input, shape index: {}]   ;;  %s986_s3 = inlined_call_operand.vmem [shape: f32[2,1,1,1], index: 3, kind: output, shape index: {0}]   ;;  %s987_s4 = inlined_call_operand.vmem [shape: f32[2,1,1,1], index: 4, kind: output, shape index: {1}]  }
   0x1   :  { %988 = sst [smem:[#allocation11_spill]] %s983_s0 }
   0x2   :  { %10 = vsyncpa [#allocation3], 0 }
   0x3   :  { %12 = vsyncpa [#allocation3 + $0x1], 0 }
   0x4   :  { %13 = vsyncpa [#allocation6], 0 }
   0x5   :  { %15 = vsyncpa [#allocation6 + $0x1], 0 }
   0x6   :  { %16 = vsyncpa [#allocation4], 0  ;;  %s828_s15 = smov 0   ;;  %s830_s16 = smov 0  }
   0x7   :  { %s832_s17 = smov 0   ;;  %s834_s18 = smov 0  }
   0x8   :  { %s836_s19 = smov 0   ;;  %s838_s20 = smov 0  }
   0x9 LB: > { %s551_s21 = sadd.s32 4294967295, %s798_s20   ;;  %s43_s22 = sadd.s32 1, %s786_s17  ;;  %s798_s20 = sphi %s838_s20, %s22_s20   ;;  %s794_s19 = sphi %s836_s19, %s998_s19   ;;  %s790_s18 = sphi %s834_s18, %s997_s18   ;;  %s786_s17 = sphi %s832_s17, %s996_s17   ;;  %s782_s16 = sphi %s830_s16, %s995_s16   ;;  %s778_s15 = sphi %s828_s15, %s994_s15  }
   0xa   : > { %p50_p0 = scmp.ne.s32.totalorder %s786_s17, %s782_s16  ;;  %p51_p1 = scmp.eq.s32.totalorder %s798_s20, 0 }
   0xb   : > { %p56_p2 = scmp.ne.s32.totalorder %s782_s16, %s778_s15  ;;  %p862_p3 = scmp.eq.s32.totalorder %s551_s21, 0 }
   0xc   : > { %p52_p4 = por %p51_p1, %p50_p0  ;;  %p553_p5 = scmp.ge.s32.totalorder %s798_s20, 1 }
   0xd   : > { %p869_p6 = por %p862_p3, %p56_p2  ;;  %p172_p7 = scmp.lt.s32.totalorder %s798_s20, 3 }
   0xe   : > { %s184_s27 = sshll.u32 %s985_s2, 4  ;;  %p598_p10 = scmp.lt.s32.totalorder %s798_s20, 2  ;;  %s185_s27 = int_to_ptr.vmem [resolvable:$true] %s184_s27 }
   0xf   : > { %p877_p8 = pnand %p553_p5, %p172_p7  ;;  %s885_s29 = sand.u32 1, %s786_s17  }
  0x10   : > { %p889_p12 = pnand %p598_p10, %p52_p4  ;;  %s800_s5 = smov [#allocation7]  }
  0x11   : > { %p586_p9 = pneg %p877_p8  ;;  %s34_s6 = sadd.s32 1, %s794_s19 }
  0x12   : > { %s556_s7 = sshll.u32 %s885_s29, 3  ;;  %p36_p13 = scmp.ge.s32.totalorder %s34_s6, 2 }
  0x13   : > { %p587_p11 = pnand %p586_p9, %p862_p3  ;;  %s573_s8 = sshll.u32 %s794_s19, 3 }
  0x14   : > { %s199_s9 = scalar_lea.vmem [#allocation2], %s556_s7  ;;  %s1000_s6 = smov (%p36_p13, %s34_s6), 0 }
  0x15   : > { %589 = dma.vmem_to_smem (!%p587_p11), %s185_s27, 16, %s800_s5, [#allocation4]  }
  0x16   : > { %s208_s10 = sshll.u32 %s199_s9, 4  ;;  %s993_s0 = sld [smem:[#allocation11_spill]]  ;;  %s209_s10 = int_to_ptr.vmem [resolvable:$true] %s208_s10 }
  0x17   : > { %s38_s14 = ssub.s32 %s794_s19, %s1000_s6  ;;  %s196_s25 = scalar_lea.sflag [#allocation3], %s885_s29 }
  0x18   : > { %p41_p0 = scmp.eq.s32.totalorder %s38_s14, 0  ;;  %s801_s26 = smov 32  }
  0x19   : > { %s802_s27 = smov 2   ;;  %s559_s5 = sshll.u32 %s885_s29, 1 }
  0x1a   : > { %s906_s21 = scalar_select %p41_p0, %s786_s17, %s43_s22  }
  0x1b   : > { %s560_s7 = sshll.u32 %s794_s19, 1  ;;  %s222_s12 = scalar_lea.vmem [#allocation5], %s559_s5 }
  0x1c   : > { %s205_s13 = scalar_lea.hbm %s993_s0, %s573_s8  ;;  %s227_s8 = scalar_lea.hbm %s984_s1, %s560_s7 }
  0x1d   : > { %s206_s15 = sshll.u32 %s205_s13, 4  ;;  %s231_s13 = sshll.u32 %s222_s12, 4  ;;  %s207_s15 = int_to_ptr.hbm [resolvable:$true] %s206_s15  ;;  %s232_s13 = int_to_ptr.vmem [resolvable:$true] %s231_s13 }
  0x1e   : > { %593 = dma.hbm_to_vmem [thread:$0]  (!%p889_p12), %s207_s15, 128, %s209_s10, %s196_s25, %s801_s26, %s801_s26, %s802_s27  }
  0x1f   : > { %s229_s0 = sshll.u32 %s227_s8, 4  ;;  %s219_s14 = scalar_lea.sflag [#allocation6], %s885_s29  ;;  %s230_s0 = int_to_ptr.hbm [resolvable:$true] %s229_s0 }
  0x20   : > { %596 = dma.hbm_to_vmem [thread:$0]  (!%p889_p12), %s230_s0, 32, %s232_s13, %s219_s14  }
  0x21   : > { %240 = sbr.rel (%p877_p8) target bundleno = 278 (0x116), region = 32  ;;  %s242_s22 = sand.u32 (!%p877_p8), 1, %s782_s16  }
  0x22   : > { %s562_s10 = sshll.u32 (!%p877_p8), %s242_s22, 3  ;;  %s243_s15 = scalar_lea.sflag (!%p877_p8), [#allocation3], %s242_s22 }
  0x23   : > { %s246_s25 = scalar_lea.vmem (!%p877_p8), [#allocation2], %s562_s10 }
  0x26   : > { %765 = dma.done.wait (%p869_p6), %s243_s15, 128  }
  0x27   : > { %767 = vsyncadd (%p869_p6), %s243_s15, 4294967168  ;;  %s563_s26 = sshll.u32 %s242_s22, 1  ;;  %s253_s27 = scalar_lea.sflag [#allocation6], %s242_s22 }
  0x28   : > { %s256_s29 = scalar_lea.vmem [#allocation5], %s563_s26 }
  0x29   : > { %769 = dma.done.wait (%p869_p6), %s253_s27, 32  }
  0x2a   : > { %771 = vsyncadd (%p869_p6), %s253_s27, 4294967264 }
  0x2b   : > { %773 = dma.done.wait (%p862_p3), [#allocation4], 16  }
  0x2c   : > { %775 = vsyncadd (%p862_p3), [#allocation4], 4294967280 }
  0x2d   : > { %267 = sfence }
  0x2e   : > { %v934_v0 = vld [vmem:[%s256_s29] sm:$0x3]  ;;  %v313_v1 = vld [vmem:[%s246_s25] sm:$0x3]  ;;  %v565_v2 = vld [vmem:[%s246_s25 + $0x2] sm:$0x3] }
  0x2f   : > { %vm314_vm0 = vcmp.eq.s32.totalorder %v934_v0, 0  ;;  %v322_v3 = vmax.f32 %v313_v1, %v565_v2  ;;  %v567_v4 = vld [vmem:[%s246_s25 + $0x4] sm:$0x3]  ;;  %v569_v5 = vld [vmem:[%s246_s25 + $0x6] sm:$0x3]  ;;  %vm321_vm1 = vcmp.eq.s32.totalorder %v934_v0, 1 }
  0x30   : > { %v315_v6 = vsel %vm314_vm0, %v313_v1, 0.0  ;;  %vm329_vm2 = vcmp.eq.s32.totalorder %v934_v0, 2  ;;  %vm337_vm3 = vcmp.eq.s32.totalorder %v934_v0, 3  ;;  %s316_s0 = sld [smem:[#allocation7]]  ;;  %vm359_vm4 = vcmp.ne.s32.totalorder %v934_v0, 4294967196  ;;  %p300_p1 = scmp.lt.s32.totalorder %s790_s18, 1 }
  0x31   : > { %v330_v7 = vmax.f32 %v322_v3, %v567_v4  ;;  %v323_v9 = vsel %vm321_vm1, %v565_v2, %v315_v6  ;;  %s566_s23 = sld [smem:[#allocation7 + $0x1]]  ;;  %vm375_vm5 = vcmask 1041408   ;;  %vm387_vm6 = vcmask 0  }
  0x32   : > { %v331_v14 = vsel %vm329_vm2, %v567_v4, %v323_v9  ;;  %s568_s24 = sld [smem:[#allocation7 + $0x2]]  ;;  %s1002_s18 = smov (!%p300_p1, %s790_s18), 1 }
  0x33   : > { %v338_v8 = vmax.f32 %v330_v7, %v569_v5  ;;  %v339_v19 = vsel %vm337_vm3, %v569_v5, %v331_v14  ;;  %s570_s28 = sld [smem:[#allocation7 + $0x3]]  ;;  %s305_s7 = scalar_lea.vmem %s986_s3, %s1002_s18 }
  0x34   : > { %s311_s12 = scalar_lea.vmem %s987_s4, %s1002_s18 }
  0x35   : > { %v343_v10 = vsub.f32 %v313_v1, %v338_v8  ;;  %v347_v11 = vsub.f32 %v565_v2, %v338_v8  ;;  %v351_v12 = vsub.f32 %v567_v4, %v338_v8  ;;  %v355_v13 = vsub.f32 %v569_v5, %v338_v8 }
  0x36   : > { %v361_v20 = vsub.f32 %v339_v19, %v338_v8  ;;  %v317_v28 = vstv %s316_s0 }
  0x37   : > { %v344_v15 = vmul.f32 1.442695, %v343_v10  ;;  %v348_v16 = vmul.f32 1.442695, %v347_v11  ;;  %v352_v17 = vmul.f32 1.442695, %v351_v12  ;;  %v325_v31 = vstv %s566_s23 }
  0x38   : > { %v356_v18 = vmul.f32 1.442695, %v355_v13  ;;  %v362_v25 = vmul.f32 1.442695, %v361_v20  ;;  %v318_v30 = vsel %vm314_vm0, %v317_v28, 0.0  ;;  %v333_v34 = vstv %s568_s24 }
  0x39   : > { %651 = vpow2.f32 %v344_v15  ;;  %v326_v33 = vsel %vm321_vm1, %v325_v31, %v318_v30  ;;  %v341_v38 = vstv %s570_s28 }
  0x3a   : > { %653 = vpow2.f32 %v348_v16  ;;  %v334_v37 = vsel %vm329_vm2, %v333_v34, %v326_v33 }
  0x3b   : > { %655 = vpow2.f32 %v352_v17  ;;  %v342_v42 = vsel %vm337_vm3, %v341_v38, %v334_v37 }
  0x3c   : > { %657 = vpow2.f32 %v356_v18  ;;  %v374_v50 = vsel %vm359_vm4, %v342_v42, 0.0 }
  0x3d   : > { %659 = vpow2.f32 %v362_v25  ;;  %v389_v51 = vsel %vm375_vm5, %v374_v50, 0.0 }
  0x3f   : > { %v652_v21 = vpop.eup %651 }
  0x40   : > { %v654_v22 = vpop.eup %653 }
  0x41   : > { %v656_v23 = vpop.eup %655  ;;  %v350_v24 = vadd.f32 %v654_v22, %v652_v21 }
  0x42   : > { %v658_v26 = vpop.eup %657 }
  0x43   : > { %v354_v27 = vadd.f32 %v656_v23, %v350_v24  ;;  %v660_v32 = vpop.eup %659 }
  0x45   : > { %v358_v29 = vadd.f32 %v658_v26, %v354_v27 }
  0x47   : > { %661 = vrcp.f32 %v358_v29 }
  0x48   : > { %663 = vlog2.f32 %v358_v29 }
  0x4d   : > { %v662_v35 = vpop.eup %661 }
  0x4e   : > { %v664_v36 = vpop.eup %663  ;;  %v364_v39 = vmul.f32 %v662_v35, %v660_v32 }
  0x4f   : > { %v366_v40 = vmul.f32 0.6931472, %v664_v36 }
  0x50   : > { %v369_v41 = vsub.f32 1.0, %v364_v39 }
  0x51   : > { %v367_v43 = vsub.f32 %v366_v40, %v361_v20 }
  0x52   : > { %v370_v44 = vmul.f32 %v369_v41, %v369_v41 }
  0x53   : > { %v368_v45 = vmin.f32 %v367_v43, 36.841362 }
  0x54   : > { %v371_v46 = vmul.f32 %v370_v44, %v342_v42 }
  0x56   : > { %v372_v47 = vmul.f32 %v371_v46, %v368_v45 }
  0x58   : > { %v373_v48 = vsel %vm359_vm4, %v372_v47, 0.0 }
  0x59   : > { %v376_v49 = vsel %vm375_vm5, %v373_v48, 0.0 }
  0x5a   : > { %377 = vadd.xlane.f32.xlu0 %v376_v49 }
  0x62   : > { %390 = vadd.xlane.f32.xlu0 %v389_v51 }
  0xcd   : > { %v378_v52 = vpop.xlane.xlu0 %377 }
  0xce   : > { %v379_v53 = vrot.slane %v378_v52, 4 }
  0xd0   : > { %v380_v54 = vadd.f32 %v379_v53, %v378_v52 }
  0xd2   : > { %v381_v55 = vrot.slane %v380_v54, 2 }
  0xd4   : > { %v382_v56 = vadd.f32 %v381_v55, %v380_v54 }
  0xd5   : > { %v391_v57 = vpop.xlane.xlu0 %390 }
  0xd6   : > { %v392_v58 = vrot.slane %v391_v57, 4  ;;  %v383_v59 = vrot.slane %v382_v56, 1 }
  0xd8   : > { %v393_v60 = vadd.f32 %v392_v58, %v391_v57  ;;  %v384_v61 = vadd.f32 %v383_v59, %v382_v56 }
  0xda   : > { %v394_v62 = vrot.slane %v393_v60, 2  ;;  %574 = vpush %v384_v61 }
  0xdc   : > { %v395_v63 = vadd.f32 %v394_v62, %v393_v60 }
  0xde   : > { %v396_v0 = vrot.slane %v395_v63, 1 }
  0xe0   : > { %v397_v1 = vadd.f32 %v396_v0, %v395_v63 }
  0xe2   : > { %576 = vpush %v397_v1 }
 0x10b   : > { %s575_s9 = spop %574 }
 0x10c   : > { %v386_v2 = vstv %s575_s9 }
 0x10d   : > { %388 = vst.msk [vmem:[%s305_s7] sm:$0x1] %vm387_vm6, %v386_v2 }
 0x113   : > { %s577_s13 = spop %576 }
 0x114   : > { %v399_v3 = vstv %s577_s13 }
 0x115   : > { %400 = vst.msk [vmem:[%s311_s12] sm:$0x1] %vm387_vm6, %v399_v3 }
 0x116 PF: > { %s22_s20 = sadd.s32 1, %s798_s20   ;;  %s994_s15 = smov %s782_s16 }
 0x117   : > { %p19_p2 = scmp.ge.s32.totalorder %s22_s20, 4   ;;  %s995_s16 = smov %s786_s17 }
 0x118   : > { %s996_s17 = smov %s906_s21  ;;  %s997_s18 = smov %s794_s19 }
 0x119   : > { %s998_s19 = smov %s1000_s6  ;;  %21 = sbr.rel (!%p19_p2) target bundleno = 9 (0x9), region = 105 }
 0x11e   :  { %442 = vsyncpa [#allocation3], 1 }
 0x11f   :  { %444 = vsyncpa [#allocation3 + $0x1], 1 }
 0x120   :  { %445 = vsyncpa [#allocation6], 1 }
 0x121   :  { %447 = vsyncpa [#allocation6 + $0x1], 1 }
 0x122   :  { %448 = vsyncpa [#allocation4], 1 }
 0x123   :  { %450 = vsyncpa [#allocation4 + $0x1], 1 }

</bundles_post_ra>
